<compile_context>
chip_gen: v7x
topology: tpu7x:2x2x1
jax: 0.10.0
libtpu: 0.0.40
codegen_flags: <defaults>
</compile_context>

<pallas_src>
import jax
import jax.numpy as jnp
from jax import lax
from jax.experimental import pallas as pl
from jax.experimental.pallas import tpu as pltpu


def _round_up(x: int, m: int) -> int:
    return (x + m - 1) // m * m


def _pad2(a, shape):
    """Zero-pad a 2-D array up to `shape` (top-left corner holds `a`)."""
    out = jnp.zeros(shape, a.dtype)
    return out.at[: a.shape[0], : a.shape[1]].set(a)


# --------------------------------------------------------------------------- #
# Kernel
# --------------------------------------------------------------------------- #
def _mlp_kernel(x_ref,
                w0_ref, b0_ref,
                w1_ref, b1_ref,
                w2_ref, b2_ref,
                w3_ref, b3_ref,
                w4_ref, b4_ref,
                w5_ref, b5_ref,
                o_ref):
    """Fused forward for one batch tile: 5x (Linear + ReLU) + scalar head."""
    wdtype = w0_ref.dtype

    def linear_relu(h, w_ref, b_ref):
        # MXU in the weight dtype (bf16 by default), f32 accumulation,
        # f32 bias-add + ReLU epilogue (padded lanes stay exactly 0).
        y = jnp.dot(h, w_ref[...],
                    preferred_element_type=jnp.float32) + b_ref[...]
        return jnp.maximum(y, 0.0)

    h = linear_relu(x_ref[...], w0_ref, b0_ref)            # [tile, Hp] f32
    h = linear_relu(h.astype(wdtype), w1_ref, b1_ref)
    h = linear_relu(h.astype(wdtype), w2_ref, b2_ref)
    h = linear_relu(h.astype(wdtype), w3_ref, b3_ref)
    h = linear_relu(h.astype(wdtype), w4_ref, b4_ref)

    # Head: out_row[1, tile] = w5[1, Hp] @ h[tile, Hp]^T  (+ bias), lane-dense.
    row = lax.dot_general(
        w5_ref[...], h.astype(wdtype),
        dimension_numbers=(((1,), (1,)), ((), ())),
        preferred_element_type=jnp.float32)                 # (1, tile)
    o_ref[...] = (row + b5_ref[...]).astype(o_ref.dtype)


# --------------------------------------------------------------------------- #
# One-time parameter prep (hoisted out of the per-call forward)
# --------------------------------------------------------------------------- #
def prepare_struct2param_params(params, *, use_bf16=True):
    """Pad / cast / transpose the 6 (W, b) pairs once.

    params: list of (W[in, out] f32, b[1, out] f32), torch Linear layout
            already transposed to [in, out].
    Returns a flat tuple of 12 arrays ready for struct2param_forward.
    """
    wdtype = jnp.bfloat16 if use_bf16 else jnp.float32
    w0, b0 = params[0]
    f = w0.shape[0]
    hidden = w0.shape[1]
    h_pad = _round_up(hidden, 128)

    flat = [_pad2(w0, (f, h_pad)).astype(wdtype),           # (F, Hp)
            _pad2(b0, (1, h_pad)).astype(jnp.float32)]
    for w, b in params[1:5]:
        flat += [_pad2(w, (h_pad, h_pad)).astype(wdtype),    # (Hp, Hp)
                 _pad2(b, (1, h_pad)).astype(jnp.float32)]
    w5, b5 = params[5]
    flat += [_pad2(w5.T, (1, h_pad)).astype(wdtype),          # (1, Hp)
             b5.astype(jnp.float32).reshape(1, 1)]            # (1, 1)
    return tuple(jax.device_put(p) for p in flat)


def _select_tile(n: int, tile_m: int):
    """Pick (tile, grid) for the batch dimension.

    - tiny batches (<=128 rows): one tile covering everything.
    - otherwise: even 128-aligned split with at least 2 grid steps (both v7x
      TensorCores get work), at most ~tile_m rows per step (amortizes the
      ~0.35us fixed per-step cost), and minimal over-padding.
    """
    n_pad0 = _round_up(n, 16)                # 16: safe sublane unit for bf16
    if n_pad0 <= 128:
        return n_pad0, 1
    g = max(-(-n_pad0 // tile_m), 2)         # cdiv, forced >= 2
    tile = _round_up(-(-n_pad0 // g), 128)   # even, lane-aligned split
    grid = -(-n_pad0 // tile)
    return tile, grid


# --------------------------------------------------------------------------- #
# Forward
# --------------------------------------------------------------------------- #
def struct2param_forward(features, prepared_params, *, tile_m=2048):
    """features: [N, F] float32.  prepared_params: prepare_struct2param_params().

    Returns [N] float32 (torch's .squeeze() of the [N, 1] head output).
    """
    n, f = features.shape
    wdtype = prepared_params[0].dtype        # compute/MXU operand dtype

    tile, grid = _select_tile(n, tile_m)
    n_pad = tile * grid

    # Batch padding only (feature dim is NOT padded); padded rows are zero.
    x = jnp.zeros((n_pad, f), wdtype).at[:n, :].set(features.astype(wdtype))

    # Weights/biases: full-array blocks, constant index_map -> VMEM resident.
    weight_specs = [pl.BlockSpec(p.shape, lambda i: (0, 0))
                    for p in prepared_params]

    out = pl.pallas_call(
        _mlp_kernel,
        out_shape=jax.ShapeDtypeStruct((1, n_pad), jnp.float32),
        grid_spec=pltpu.PrefetchScalarGridSpec(
            num_scalar_prefetch=0,
            grid=(grid,),
            in_specs=[pl.BlockSpec((tile, f), lambda i: (i, 0))] + weight_specs,
            out_specs=pl.BlockSpec((1, tile), lambda i: (0, i)),
        ),
        compiler_params=pltpu.CompilerParams(
            dimension_semantics=("parallel",)),
    )(x, *prepared_params)

    # Drop batch padding and squeeze to [N] (torch .squeeze() semantics).
    return out[0, :n]


# --------------------------------------------------------------------------- #
# Init + reference
# --------------------------------------------------------------------------- #
def init_struct2param_params(key, num_features, hidden_layer_width=90):
    """torch.nn.Linear default init (U[-1/sqrt(fan_in), +1/sqrt(fan_in)]).

    Weights returned already transposed to [in, out]; biases as [1, out].
    """
    dims = [num_features] + [hidden_layer_width] * 5 + [1]
    params = []
    for i in range(6):
        fan_in, fan_out = dims[i], dims[i + 1]
        key, kw, kb = jax.random.split(key, 3)
        bound = 1.0 / jnp.sqrt(float(fan_in))
        w = jax.random.uniform(kw, (fan_in, fan_out), jnp.float32, -bound, bound)
        b = jax.random.uniform(kb, (1, fan_out), jnp.float32, -bound, bound)
        params.append((w, b))
    return params


def struct2param_reference(features, params):
    """Plain-JAX reference for sanity checking."""
    h = features
    for i, (w, b) in enumerate(params):
        h = h @ w + b
        if i < len(params) - 1:
            h = jnp.maximum(h, 0.0)
    return jnp.squeeze(h, axis=-1)


# --------------------------------------------------------------------------- #
# Self-test
# --------------------------------------------------------------------------- #
if __name__ == "__main__":
    key = jax.random.PRNGKey(0)
    key, kx = jax.random.split(key)

    num_features = 32
    hidden_layer_width = 90

    params = init_struct2param_params(key, num_features, hidden_layer_width)
    prep_bf16 = prepare_struct2param_params(params, use_bf16=True)    # default
    prep_f32 = prepare_struct2param_params(params, use_bf16=False)

    # 1) Small batch (single grid step), exact-f32 path: tight tolerance.
    feats_small = jax.random.normal(kx, (16, num_features), dtype=jnp.float32)
    out_small = jax.block_until_ready(
        struct2param_forward(feats_small, prep_f32))
    ref_small = struct2param_reference(feats_small, params)
    assert out_small.shape == (16,)
    assert jnp.allclose(out_small, ref_small, atol=1e-4, rtol=1e-4), \
        "Pallas f32 output mismatch vs reference (small batch)"

    # 2) Multi-tile batch that is NOT a tile multiple (exercises batch padding,
    #    grid >= 2, lane-dense multi-step output blocks), exact-f32 path.
    key, kx2 = jax.random.split(key)
    feats_big = jax.random.normal(kx2, (300, num_features), dtype=jnp.float32)
    out_big = jax.block_until_ready(
        struct2param_forward(feats_big, prep_f32, tile_m=128))
    ref_big = struct2param_reference(feats_big, params)
    assert out_big.shape == (300,)
    assert jnp.allclose(out_big, ref_big, atol=1e-4, rtol=1e-4), \
        "Pallas f32 output mismatch vs reference (multi-tile batch)"

    # 3) Default bf16-MXU-operand fast path (f32 accumulation + f32 epilogue),
    #    looser tolerance for bf16 operand rounding.
    out_bf16 = jax.block_until_ready(
        struct2param_forward(feats_big, prep_bf16))
    assert out_bf16.shape == (300,)
    assert jnp.allclose(out_bf16, ref_big, atol=1e-1, rtol=5e-2), \
        "Pallas bf16 output mismatch vs reference"

    # 4) Default path, small batch.
    out_bf16_s = jax.block_until_ready(
        struct2param_forward(feats_small, prep_bf16))
    assert out_bf16_s.shape == (16,)
    assert jnp.allclose(out_bf16_s, ref_small, atol=1e-1, rtol=5e-2), \
        "Pallas bf16 output mismatch vs reference (small batch)"

    print("KERNEL_OK")
</pallas_src>

<mosaic_0001>
module attributes {stable_mosaic.version = 11 : i64} {
  func.func @_mlp_kernel(%arg0: i32, %arg1: memref<16x32xf32, #tpu.memory_space<vmem>>, %arg2: memref<32x128xf32, #tpu.memory_space<vmem>>, %arg3: memref<1x128xf32, #tpu.memory_space<vmem>>, %arg4: memref<128x128xf32, #tpu.memory_space<vmem>>, %arg5: memref<1x128xf32, #tpu.memory_space<vmem>>, %arg6: memref<128x128xf32, #tpu.memory_space<vmem>>, %arg7: memref<1x128xf32, #tpu.memory_space<vmem>>, %arg8: memref<128x128xf32, #tpu.memory_space<vmem>>, %arg9: memref<1x128xf32, #tpu.memory_space<vmem>>, %arg10: memref<128x128xf32, #tpu.memory_space<vmem>>, %arg11: memref<1x128xf32, #tpu.memory_space<vmem>>, %arg12: memref<1x128xf32, #tpu.memory_space<vmem>>, %arg13: memref<1x1xf32, #tpu.memory_space<vmem>>, %arg14: memref<1x16xf32, #tpu.memory_space<vmem>>) attributes {dimension_semantics = [#tpu.dimension_semantics<parallel>], iteration_bounds = array<i64: 1>, scalar_prefetch = 0 : i64, scratch_operands = 0 : i64, tpu.core_type = #tpu.core_type<tc>, window_params = [{transform_indices = @transform_0, window_bounds = array<i64: 16, 32>}, {pipeline_mode = #tpu.pipeline_mode<synchronous>, transform_indices = @transform_1, window_bounds = array<i64: 32, 128>}, {pipeline_mode = #tpu.pipeline_mode<synchronous>, transform_indices = @transform_2, window_bounds = array<i64: 1, 128>}, {pipeline_mode = #tpu.pipeline_mode<synchronous>, transform_indices = @transform_3, window_bounds = array<i64: 128, 128>}, {pipeline_mode = #tpu.pipeline_mode<synchronous>, transform_indices = @transform_4, window_bounds = array<i64: 1, 128>}, {pipeline_mode = #tpu.pipeline_mode<synchronous>, transform_indices = @transform_5, window_bounds = array<i64: 128, 128>}, {pipeline_mode = #tpu.pipeline_mode<synchronous>, transform_indices = @transform_6, window_bounds = array<i64: 1, 128>}, {pipeline_mode = #tpu.pipeline_mode<synchronous>, transform_indices = @transform_7, window_bounds = array<i64: 128, 128>}, {pipeline_mode = #tpu.pipeline_mode<synchronous>, transform_indices = @transform_8, window_bounds = array<i64: 1, 128>}, {pipeline_mode = #tpu.pipeline_mode<synchronous>, transform_indices = @transform_9, window_bounds = array<i64: 128, 128>}, {pipeline_mode = #tpu.pipeline_mode<synchronous>, transform_indices = @transform_10, window_bounds = array<i64: 1, 128>}, {pipeline_mode = #tpu.pipeline_mode<synchronous>, transform_indices = @transform_11, window_bounds = array<i64: 1, 128>}, {pipeline_mode = #tpu.pipeline_mode<synchronous>, transform_indices = @transform_12, window_bounds = array<i64: 1, 1>}, {transform_indices = @transform_13, window_bounds = array<i64: 1, 16>}]} {
    %c0 = arith.constant 0 : index
    %c0_0 = arith.constant 0 : index
    %0 = vector.load %arg1[%c0, %c0_0] : memref<16x32xf32, #tpu.memory_space<vmem>>, vector<16x32xf32>
    %c0_1 = arith.constant 0 : index
    %c0_2 = arith.constant 0 : index
    %1 = vector.load %arg2[%c0_1, %c0_2] : memref<32x128xf32, #tpu.memory_space<vmem>>, vector<32x128xf32>
    %cst = arith.constant dense<0.000000e+00> : vector<16x128xf32>
    %2 = tpu.matmul %0, %1, %cst {dimension_numbers = #tpu.dot_dimension_numbers<[1], [0], [0], [1], [0, 0, 1, 1], [], []>} : vector<16x32xf32>, vector<32x128xf32>, vector<16x128xf32> -> vector<16x128xf32>
    %c0_3 = arith.constant 0 : index
    %c0_4 = arith.constant 0 : index
    %3 = vector.load %arg3[%c0_3, %c0_4] : memref<1x128xf32, #tpu.memory_space<vmem>>, vector<1x128xf32>
    %4 = vector.broadcast %3 : vector<1x128xf32> to vector<16x128xf32>
    %5 = arith.addf %2, %4 : vector<16x128xf32>
    %cst_5 = arith.constant 0.000000e+00 : f32
    %6 = vector.broadcast %cst_5 : f32 to vector<16x128xf32>
    %7 = arith.maximumf %5, %6 : vector<16x128xf32>
    %c0_6 = arith.constant 0 : index
    %c0_7 = arith.constant 0 : index
    %8 = vector.load %arg4[%c0_6, %c0_7] : memref<128x128xf32, #tpu.memory_space<vmem>>, vector<128x128xf32>
    %cst_8 = arith.constant dense<0.000000e+00> : vector<16x128xf32>
    %9 = tpu.matmul %7, %8, %cst_8 {dimension_numbers = #tpu.dot_dimension_numbers<[1], [0], [0], [1], [0, 0, 1, 1], [], []>} : vector<16x128xf32>, vector<128x128xf32>, vector<16x128xf32> -> vector<16x128xf32>
    %c0_9 = arith.constant 0 : index
    %c0_10 = arith.constant 0 : index
    %10 = vector.load %arg5[%c0_9, %c0_10] : memref<1x128xf32, #tpu.memory_space<vmem>>, vector<1x128xf32>
    %11 = vector.broadcast %10 : vector<1x128xf32> to vector<16x128xf32>
    %12 = arith.addf %9, %11 : vector<16x128xf32>
    %cst_11 = arith.constant 0.000000e+00 : f32
    %13 = vector.broadcast %cst_11 : f32 to vector<16x128xf32>
    %14 = arith.maximumf %12, %13 : vector<16x128xf32>
    %c0_12 = arith.constant 0 : index
    %c0_13 = arith.constant 0 : index
    %15 = vector.load %arg6[%c0_12, %c0_13] : memref<128x128xf32, #tpu.memory_space<vmem>>, vector<128x128xf32>
    %cst_14 = arith.constant dense<0.000000e+00> : vector<16x128xf32>
    %16 = tpu.matmul %14, %15, %cst_14 {dimension_numbers = #tpu.dot_dimension_numbers<[1], [0], [0], [1], [0, 0, 1, 1], [], []>} : vector<16x128xf32>, vector<128x128xf32>, vector<16x128xf32> -> vector<16x128xf32>
    %c0_15 = arith.constant 0 : index
    %c0_16 = arith.constant 0 : index
    %17 = vector.load %arg7[%c0_15, %c0_16] : memref<1x128xf32, #tpu.memory_space<vmem>>, vector<1x128xf32>
    %18 = vector.broadcast %17 : vector<1x128xf32> to vector<16x128xf32>
    %19 = arith.addf %16, %18 : vector<16x128xf32>
    %cst_17 = arith.constant 0.000000e+00 : f32
    %20 = vector.broadcast %cst_17 : f32 to vector<16x128xf32>
    %21 = arith.maximumf %19, %20 : vector<16x128xf32>
    %c0_18 = arith.constant 0 : index
    %c0_19 = arith.constant 0 : index
    %22 = vector.load %arg8[%c0_18, %c0_19] : memref<128x128xf32, #tpu.memory_space<vmem>>, vector<128x128xf32>
    %cst_20 = arith.constant dense<0.000000e+00> : vector<16x128xf32>
    %23 = tpu.matmul %21, %22, %cst_20 {dimension_numbers = #tpu.dot_dimension_numbers<[1], [0], [0], [1], [0, 0, 1, 1], [], []>} : vector<16x128xf32>, vector<128x128xf32>, vector<16x128xf32> -> vector<16x128xf32>
    %c0_21 = arith.constant 0 : index
    %c0_22 = arith.constant 0 : index
    %24 = vector.load %arg9[%c0_21, %c0_22] : memref<1x128xf32, #tpu.memory_space<vmem>>, vector<1x128xf32>
    %25 = vector.broadcast %24 : vector<1x128xf32> to vector<16x128xf32>
    %26 = arith.addf %23, %25 : vector<16x128xf32>
    %cst_23 = arith.constant 0.000000e+00 : f32
    %27 = vector.broadcast %cst_23 : f32 to vector<16x128xf32>
    %28 = arith.maximumf %26, %27 : vector<16x128xf32>
    %c0_24 = arith.constant 0 : index
    %c0_25 = arith.constant 0 : index
    %29 = vector.load %arg10[%c0_24, %c0_25] : memref<128x128xf32, #tpu.memory_space<vmem>>, vector<128x128xf32>
    %cst_26 = arith.constant dense<0.000000e+00> : vector<16x128xf32>
    %30 = tpu.matmul %28, %29, %cst_26 {dimension_numbers = #tpu.dot_dimension_numbers<[1], [0], [0], [1], [0, 0, 1, 1], [], []>} : vector<16x128xf32>, vector<128x128xf32>, vector<16x128xf32> -> vector<16x128xf32>
    %c0_27 = arith.constant 0 : index
    %c0_28 = arith.constant 0 : index
    %31 = vector.load %arg11[%c0_27, %c0_28] : memref<1x128xf32, #tpu.memory_space<vmem>>, vector<1x128xf32>
    %32 = vector.broadcast %31 : vector<1x128xf32> to vector<16x128xf32>
    %33 = arith.addf %30, %32 : vector<16x128xf32>
    %cst_29 = arith.constant 0.000000e+00 : f32
    %34 = vector.broadcast %cst_29 : f32 to vector<16x128xf32>
    %35 = arith.maximumf %33, %34 : vector<16x128xf32>
    %c0_30 = arith.constant 0 : index
    %c0_31 = arith.constant 0 : index
    %36 = vector.load %arg12[%c0_30, %c0_31] : memref<1x128xf32, #tpu.memory_space<vmem>>, vector<1x128xf32>
    %cst_32 = arith.constant dense<0.000000e+00> : vector<1x16xf32>
    %37 = tpu.matmul %36, %35, %cst_32 {dimension_numbers = #tpu.dot_dimension_numbers<[1], [1], [0], [0], [0, 0, 1, 0], [], []>} : vector<1x128xf32>, vector<16x128xf32>, vector<1x16xf32> -> vector<1x16xf32>
    %c0_33 = arith.constant 0 : index
    %c0_34 = arith.constant 0 : index
    %38 = vector.load %arg13[%c0_33, %c0_34] : memref<1x1xf32, #tpu.memory_space<vmem>>, vector<1x1xf32>
    %39 = vector.broadcast %38 : vector<1x1xf32> to vector<1x16xf32>
    %40 = arith.addf %37, %39 : vector<1x16xf32>
    %c0_35 = arith.constant 0 : index
    %c0_36 = arith.constant 0 : index
    %41 = vector.load %arg14[%c0_35, %c0_36] : memref<1x16xf32, #tpu.memory_space<vmem>>, vector<1x16xf32>
    tpu.vector_store %arg14[%c0_35, %c0_36], %40 {strides = array<i32>} : memref<1x16xf32, #tpu.memory_space<vmem>>, vector<1x16xf32>,
    return
  }
  func.func @transform_0(%arg0: i32) -> (i32, i32) {
    %c0_i32 = arith.constant 0 : i32
    %c0_i32_0 = arith.constant 0 : i32
    return %arg0, %c0_i32 : i32, i32
  }
  func.func @transform_1(%arg0: i32) -> (i32, i32) {
    %c0_i32 = arith.constant 0 : i32
    %c0_i32_0 = arith.constant 0 : i32
    %c0_i32_1 = arith.constant 0 : i32
    return %c0_i32, %c0_i32_0 : i32, i32
  }
  func.func @transform_2(%arg0: i32) -> (i32, i32) {
    %c0_i32 = arith.constant 0 : i32
    %c0_i32_0 = arith.constant 0 : i32
    %c0_i32_1 = arith.constant 0 : i32
    return %c0_i32, %c0_i32_0 : i32, i32
  }
  func.func @transform_3(%arg0: i32) -> (i32, i32) {
    %c0_i32 = arith.constant 0 : i32
    %c0_i32_0 = arith.constant 0 : i32
    %c0_i32_1 = arith.constant 0 : i32
    return %c0_i32, %c0_i32_0 : i32, i32
  }
  func.func @transform_4(%arg0: i32) -> (i32, i32) {
    %c0_i32 = arith.constant 0 : i32
    %c0_i32_0 = arith.constant 0 : i32
    %c0_i32_1 = arith.constant 0 : i32
    return %c0_i32, %c0_i32_0 : i32, i32
  }
  func.func @transform_5(%arg0: i32) -> (i32, i32) {
    %c0_i32 = arith.constant 0 : i32
    %c0_i32_0 = arith.constant 0 : i32
    %c0_i32_1 = arith.constant 0 : i32
    return %c0_i32, %c0_i32_0 : i32, i32
  }
  func.func @transform_6(%arg0: i32) -> (i32, i32) {
    %c0_i32 = arith.constant 0 : i32
    %c0_i32_0 = arith.constant 0 : i32
    %c0_i32_1 = arith.constant 0 : i32
    return %c0_i32, %c0_i32_0 : i32, i32
  }
  func.func @transform_7(%arg0: i32) -> (i32, i32) {
    %c0_i32 = arith.constant 0 : i32
    %c0_i32_0 = arith.constant 0 : i32
    %c0_i32_1 = arith.constant 0 : i32
    return %c0_i32, %c0_i32_0 : i32, i32
  }
  func.func @transform_8(%arg0: i32) -> (i32, i32) {
    %c0_i32 = arith.constant 0 : i32
    %c0_i32_0 = arith.constant 0 : i32
    %c0_i32_1 = arith.constant 0 : i32
    return %c0_i32, %c0_i32_0 : i32, i32
  }
  func.func @transform_9(%arg0: i32) -> (i32, i32) {
    %c0_i32 = arith.constant 0 : i32
    %c0_i32_0 = arith.constant 0 : i32
    %c0_i32_1 = arith.constant 0 : i32
    return %c0_i32, %c0_i32_0 : i32, i32
  }
  func.func @transform_10(%arg0: i32) -> (i32, i32) {
    %c0_i32 = arith.constant 0 : i32
    %c0_i32_0 = arith.constant 0 : i32
    %c0_i32_1 = arith.constant 0 : i32
    return %c0_i32, %c0_i32_0 : i32, i32
  }
  func.func @transform_11(%arg0: i32) -> (i32, i32) {
    %c0_i32 = arith.constant 0 : i32
    %c0_i32_0 = arith.constant 0 : i32
    %c0_i32_1 = arith.constant 0 : i32
    return %c0_i32, %c0_i32_0 : i32, i32
  }
  func.func @transform_12(%arg0: i32) -> (i32, i32) {
    %c0_i32 = arith.constant 0 : i32
    %c0_i32_0 = arith.constant 0 : i32
    %c0_i32_1 = arith.constant 0 : i32
    return %c0_i32, %c0_i32_0 : i32, i32
  }
  func.func @transform_13(%arg0: i32) -> (i32, i32) {
    %c0_i32 = arith.constant 0 : i32
    %c0_i32_0 = arith.constant 0 : i32
    return %c0_i32, %arg0 : i32, i32
  }
}

</mosaic_0001>

<bundles_post_ra>
// kernel: tpu_custom_call.1
= control target key start
LH: loop header
LB: loop body
LE: loop exit
PB: predicated region body
PF: predicated region fallthrough
CT: control target
= control target key end

     0   :  { %s1519_s0 = inlined_call_operand.hbm [shape: f32[16,32], index: 0, kind: input, shape index: {}]   ;;  %s1520_s1 = inlined_call_operand.hbm [shape: f32[32,128], index: 1, kind: input, shape index: {}]   ;;  %s1521_s2 = inlined_call_operand.vmem [shape: f32[1,128], index: 2, kind: input, shape index: {}]   ;;  %s1522_s3 = inlined_call_operand.hbm [shape: f32[128,128], index: 3, kind: input, shape index: {}]   ;;  %s1523_s4 = inlined_call_operand.vmem [shape: f32[1,128], index: 4, kind: input, shape index: {}]   ;;  %s1524_s5 = inlined_call_operand.hbm [shape: f32[128,128], index: 5, kind: input, shape index: {}]   ;;  %s1525_s6 = inlined_call_operand.vmem [shape: f32[1,128], index: 6, kind: input, shape index: {}]   ;;  %s1526_s7 = inlined_call_operand.hbm [shape: f32[128,128], index: 7, kind: input, shape index: {}]   ;;  %s1527_s8 = inlined_call_operand.vmem [shape: f32[1,128], index: 8, kind: input, shape index: {}]   ;;  %s1528_s9 = inlined_call_operand.hbm [shape: f32[128,128], index: 9, kind: input, shape index: {}]   ;;  %s1529_s10 = inlined_call_operand.vmem [shape: f32[1,128], index: 10, kind: input, shape index: {}]   ;;  %s1530_s11 = inlined_call_operand.vmem [shape: f32[1,128], index: 11, kind: input, shape index: {}]   ;;  %s1531_s12 = inlined_call_operand.<no memory space> [shape: f32[1,1], index: 12, kind: input, shape index: {}]   ;;  %s1532_s13 = inlined_call_operand.hbm [shape: f32[1,16], index: 13, kind: output, shape index: {}]  }
   0x1   :  { %v18_v0 = vstv %s1531_s12 }
   0x2   :  { %19 = vst [vmem:[#allocation2] sm:$0x1] %v18_v0 }
   0x3   :  { %20 = vsyncpa [#allocation4], 0 }
   0x4   :  { %21 = vsyncpa [#allocation7], 0 }
   0x5   :  { %22 = vsyncpa [#allocation10], 0 }
   0x6   :  { %23 = vsyncpa [#allocation13], 0 }
   0x7   :  { %24 = vsyncpa [#allocation5], 0  ;;  %s1290_s27 = smov [#allocation6]   ;;  %s1291_s29 = smov [#allocation9]  }
   0x8   :  { %s42_s28 = sshll.u32 %s1290_s27, 4  ;;  %s70_s30 = sshll.u32 %s1291_s29, 4  ;;  %s43_s28 = int_to_ptr.vmem [resolvable:$true] %s42_s28  ;;  %s1376_s30 = int_to_ptr.vmem [resolvable:$true] %s70_s30 }
   0x9   :  { %s1126_s16 = scalar_lea.hbm %s1520_s1, 512 }
   0xa   :  { %p1127_p0 = scmp.ne.s32.totalorder %s1520_s1, %s1126_s16  ;;  %p1130_p1 = scmp.lt.u32.totalorder %s1126_s16, %s1520_s1 }
   0xc   :  { %p1132_p2 = pnand %p1130_p1, %p1127_p0 }
   0xe   :  { %1135 = shalt.err (!%p1132_p2)
}
   0xf   :  { %s1136_s20 = scalar_lea.vmem %s43_s28, 512  ;;  %p1141_p4 = scmp.lt.s32.totalorder %s43_s28, %s43_s28 }
  0x10   :  { %p1137_p3 = scmp.ne.s32.totalorder %s43_s28, %s1136_s20  ;;  %p1142_p5 = scmp.lt.s32.totalorder %s1136_s20, %s1136_s20 }
  0x12   :  { %p1143_p6 = por %p1142_p5, %p1141_p4 }
  0x14   :  { %p1144_p7 = pnand %p1143_p6, %p1137_p3 }
  0x16   :  { %1147 = shalt.err (!%p1144_p7)
}
  0x17   :  { %s1292_s21 = smov 128   ;;  %s1293_s22 = smov 8  }
  0x18   :  { %48 = dma.hbm_to_vmem [thread:$0]  %s1520_s1, 512, %s43_s28, [#allocation7], %s1292_s21, %s1292_s21, %s1293_s22  }
  0x19   :  { %s1148_s27 = scalar_lea.hbm %s1524_s5, 2048 }
  0x1a   :  { %p1149_p8 = scmp.ne.s32.totalorder %s1524_s5, %s1148_s27  ;;  %p1152_p9 = scmp.lt.u32.totalorder %s1148_s27, %s1524_s5 }
  0x1c   :  { %p1154_p10 = pnand %p1152_p9, %p1149_p8 }
  0x1e   :  { %1157 = shalt.err (!%p1154_p10)
}
  0x1f   :  { %s1158_s17 = scalar_lea.vmem %s1376_s30, 2048  ;;  %p1163_p12 = scmp.lt.s32.totalorder %s1376_s30, %s1376_s30 }
  0x20   :  { %p1159_p11 = scmp.ne.s32.totalorder %s1376_s30, %s1158_s17  ;;  %p1164_p13 = scmp.lt.s32.totalorder %s1158_s17, %s1158_s17 }
  0x22   :  { %p1165_p0 = por %p1164_p13, %p1163_p12 }
  0x24   :  { %p1166_p1 = pnand %p1165_p0, %p1159_p11 }
  0x26   :  { %1169 = shalt.err (!%p1166_p1)
}
  0x27   :  { %76 = dma.hbm_to_vmem [thread:$0]  %s1524_s5, 2048, %s1376_s30, [#allocation10], %s1292_s21, %s1292_s21, %s1293_s22  }
  0x28   :  { %s1294_s18 = smov [#allocation3]   ;;  %s1295_s19 = smov [#allocation8]  }
  0x29   :  { %s30_s12 = sshll.u32 %s1294_s18, 4  ;;  %s56_s20 = sshll.u32 %s1295_s19, 4  ;;  %s31_s12 = int_to_ptr.vmem [resolvable:$true] %s30_s12  ;;  %s1413_s20 = int_to_ptr.vmem [resolvable:$true] %s56_s20 }
  0x2a   :  { %s1170_s25 = scalar_lea.hbm %s1519_s0, 256 }
  0x2b   :  { %p1171_p2 = scmp.ne.s32.totalorder %s1519_s0, %s1170_s25  ;;  %p1174_p3 = scmp.lt.u32.totalorder %s1170_s25, %s1519_s0 }
  0x2d   :  { %p1176_p4 = pnand %p1174_p3, %p1171_p2 }
  0x2f   :  { %1179 = shalt.err (!%p1176_p4)
}
  0x30   :  { %s1180_s5 = scalar_lea.vmem %s31_s12, 256  ;;  %p1185_p6 = scmp.lt.s32.totalorder %s31_s12, %s31_s12 }
  0x31   :  { %p1181_p5 = scmp.ne.s32.totalorder %s31_s12, %s1180_s5  ;;  %p1186_p7 = scmp.lt.s32.totalorder %s1180_s5, %s1180_s5 }
  0x33   :  { %p1187_p8 = por %p1186_p7, %p1185_p6 }
  0x35   :  { %p1188_p9 = pnand %p1187_p8, %p1181_p5 }
  0x37   :  { %1191 = shalt.err (!%p1188_p9)
}
  0x38   :  { %36 = dma.hbm_to_vmem [thread:$0]  %s1519_s0, 256, %s31_s12, [#allocation4], %s1292_s21, %s1292_s21, %s1293_s22  }
  0x39   :  { %s1192_s1 = scalar_lea.hbm %s1522_s3, 2048 }
  0x3a   :  { %p1193_p10 = scmp.ne.s32.totalorder %s1522_s3, %s1192_s1  ;;  %p1196_p11 = scmp.lt.u32.totalorder %s1192_s1, %s1522_s3 }
  0x3c   :  { %p1198_p12 = pnand %p1196_p11, %p1193_p10 }
  0x3e   :  { %1201 = shalt.err (!%p1198_p12)
}
  0x3f   :  { %s1202_s24 = scalar_lea.vmem %s1413_s20, 2048  ;;  %p1207_p0 = scmp.lt.s32.totalorder %s1413_s20, %s1413_s20 }
  0x40   :  { %p1203_p13 = scmp.ne.s32.totalorder %s1413_s20, %s1202_s24  ;;  %p1208_p1 = scmp.lt.s32.totalorder %s1202_s24, %s1202_s24 }
  0x42   :  { %p1209_p2 = por %p1208_p1, %p1207_p0 }
  0x44   :  { %p1210_p3 = pnand %p1209_p2, %p1203_p13 }
  0x46   :  { %1213 = shalt.err (!%p1210_p3)
}
  0x47   :  { %62 = dma.hbm_to_vmem [thread:$0]  %s1522_s3, 2048, %s1413_s20, [#allocation7], %s1292_s21, %s1292_s21, %s1293_s22  }
  0x48   :  { %s1296_s25 = smov [#allocation11]   ;;  %s1297_s27 = smov [#allocation12]  }
  0x49   :  { %s84_s26 = sshll.u32 %s1296_s25, 4  ;;  %s98_s29 = sshll.u32 %s1297_s27, 4  ;;  %s85_s26 = int_to_ptr.vmem [resolvable:$true] %s84_s26  ;;  %s1450_s29 = int_to_ptr.vmem [resolvable:$true] %s98_s29 }
  0x4a   :  { %s1214_s30 = scalar_lea.hbm %s1526_s7, 2048 }
  0x4b   :  { %p1215_p4 = scmp.ne.s32.totalorder %s1526_s7, %s1214_s30  ;;  %p1218_p5 = scmp.lt.u32.totalorder %s1214_s30, %s1526_s7 }
  0x4d   :  { %p1220_p6 = pnand %p1218_p5, %p1215_p4 }
  0x4f   :  { %1223 = shalt.err (!%p1220_p6)
}
  0x50   :  { %s1224_s3 = scalar_lea.vmem %s85_s26, 2048  ;;  %p1229_p8 = scmp.lt.s32.totalorder %s85_s26, %s85_s26 }
  0x51   :  { %p1225_p7 = scmp.ne.s32.totalorder %s85_s26, %s1224_s3  ;;  %p1230_p9 = scmp.lt.s32.totalorder %s1224_s3, %s1224_s3 }
  0x53   :  { %p1231_p10 = por %p1230_p9, %p1229_p8 }
  0x55   :  { %p1232_p11 = pnand %p1231_p10, %p1225_p7 }
  0x57   :  { %1235 = shalt.err (!%p1232_p11)
}
  0x58   :  { %90 = dma.hbm_to_vmem [thread:$0]  %s1526_s7, 2048, %s85_s26, [#allocation10], %s1292_s21, %s1292_s21, %s1293_s22  }
  0x59   :  { %s1236_s23 = scalar_lea.hbm %s1528_s9, 2048 }
  0x5a   :  { %p1237_p12 = scmp.ne.s32.totalorder %s1528_s9, %s1236_s23  ;;  %p1240_p13 = scmp.lt.u32.totalorder %s1236_s23, %s1528_s9 }
  0x5c   :  { %p1242_p0 = pnand %p1240_p13, %p1237_p12 }
  0x5e   :  { %1245 = shalt.err (!%p1242_p0)
}
  0x5f   :  { %s1246_s27 = scalar_lea.vmem %s1450_s29, 2048  ;;  %p1251_p2 = scmp.lt.s32.totalorder %s1450_s29, %s1450_s29 }
  0x60   :  { %p1247_p1 = scmp.ne.s32.totalorder %s1450_s29, %s1246_s27  ;;  %p1252_p3 = scmp.lt.s32.totalorder %s1246_s27, %s1246_s27 }
  0x62   :  { %p1253_p4 = por %p1252_p3, %p1251_p2 }
  0x64   :  { %p1254_p5 = pnand %p1253_p4, %p1247_p1 }
  0x66   :  { %1257 = shalt.err (!%p1254_p5)
}
  0x67   :  { %104 = dma.hbm_to_vmem [thread:$0]  %s1528_s9, 2048, %s1450_s29, [#allocation13], %s1292_s21, %s1292_s21, %s1293_s22  }
  0x68   :  { %1280 = dma.done.wait [#allocation4], 256  }
  0x69   :  { %1281 = vsyncadd [#allocation4], 4294967040 }
  0x6a   :  { %1282 = dma.done.wait [#allocation7], 2560  }
  0x6b   :  { %1283 = vsyncadd [#allocation7], 4294964736 }
  0x6c   :  { %1284 = dma.done.wait [#allocation10], 4096  }
  0x6d   :  { %1285 = vsyncadd [#allocation10], 4294963200 }
  0x6e   :  { %1286 = dma.done.wait [#allocation13], 2048  }
  0x6f   :  { %1287 = vsyncadd [#allocation13], 4294965248  ;;  %vm142_vm0 = vcmask 261120   ;;  %v131_v1 = vld [vmem:[#allocation6] sm:$0xff]  ;;  %v132_v2 = vld [vmem:[#allocation6 + $0x8] sm:$0xff]  ;;  %vm1299_vm1 = vmmov 0  }
  0x70   :  { %v133_v3 = vld [vmem:[#allocation6 + $0x10] sm:$0xff]  ;;  %v973_v4 = vpack.c.bf16 %v132_v2, %v131_v1  ;;  %v134_v5 = vld [vmem:[#allocation6 + $0x18] sm:$0xff]  ;;  %v226_v8 = vld [vmem:[#allocation8] sm:$0xff]  ;;  %s1302_s16 = smov [#allocation14]   ;;  %vm707_vm2 = vcmask 122880  }
  0x71   :  { %v129_v6 = vld [vmem:[#allocation3] sm:$0xff]  ;;  %v977_v7 = vpack.c.bf16 %v134_v5, %v133_v3  ;;  %v227_v9 = vld [vmem:[#allocation8 + $0x8] sm:$0xff]  ;;  %v229_v12 = vld [vmem:[#allocation8 + $0x18] sm:$0xff] }
  0x72   :  { %823 = vmatprep.mubr.msk.f32.mxu0 %vm142_vm0, %v129_v6  ;;  %v228_v10 = vld [vmem:[#allocation8 + $0x10] sm:$0xff]  ;;  %974 = vmatprep.subr.bf16.mxu0 %v973_v4  ;;  %v981_v11 = vpack.c.bf16 %v227_v9, %v226_v8  ;;  %v230_v14 = vld [vmem:[#allocation8 + $0x20] sm:$0xff]  ;;  %v231_v15 = vld [vmem:[#allocation8 + $0x28] sm:$0xff] }
  0x73   :  { %976 = vmatpush3.bf16.msra.mxu0 %v973_v4  ;;  %v985_v13 = vpack.c.bf16 %v229_v12, %v228_v10  ;;  %v989_v16 = vpack.c.bf16 %v231_v15, %v230_v14  ;;  %v130_v17 = vld [vmem:[#allocation3 + $0x8] sm:$0xff]  ;;  %v232_v18 = vld [vmem:[#allocation8 + $0x30] sm:$0xff]  ;;  %v234_v21 = vld [vmem:[#allocation8 + $0x40] sm:$0xff] }
  0x74   :  { %978 = vmatprep.subr.bf16.mxu0 %v977_v7  ;;  %982 = vmatprep.subr.bf16.mxu1 %v981_v11  ;;  %v233_v19 = vld [vmem:[#allocation8 + $0x38] sm:$0xff]  ;;  %v235_v22 = vld [vmem:[#allocation8 + $0x48] sm:$0xff]  ;;  %v236_v24 = vld [vmem:[#allocation8 + $0x50] sm:$0xff] }
  0x75   :  { %984 = vmatpush3.bf16.msra.mxu1 %v981_v11  ;;  %v993_v20 = vpack.c.bf16 %v233_v19, %v232_v18  ;;  %v997_v23 = vpack.c.bf16 %v235_v22, %v234_v21  ;;  %v237_v25 = vld [vmem:[#allocation8 + $0x58] sm:$0xff]  ;;  %v238_v27 = vld [vmem:[#allocation8 + $0x60] sm:$0xff]  ;;  %v239_v28 = vld [vmem:[#allocation8 + $0x68] sm:$0xff] }
  0x76   :  { %986 = vmatprep.subr.bf16.mxu1 %v985_v13  ;;  %v1001_v26 = vpack.c.bf16 %v237_v25, %v236_v24  ;;  %v1005_v29 = vpack.c.bf16 %v239_v28, %v238_v27  ;;  %v240_v30 = vld [vmem:[#allocation8 + $0x70] sm:$0xff]  ;;  %v241_v31 = vld [vmem:[#allocation8 + $0x78] sm:$0xff]  ;;  %v326_v33 = vld [vmem:[#allocation9] sm:$0xff] }
  0x77   :  { %980 = vmatpush3.bf16.msra.mxu0 %v977_v7  ;;  %v1009_v32 = vpack.c.bf16 %v241_v31, %v240_v30  ;;  %v327_v34 = vld [vmem:[#allocation9 + $0x8] sm:$0xff]  ;;  %v328_v35 = vld [vmem:[#allocation9 + $0x10] sm:$0xff]  ;;  %v329_v37 = vld [vmem:[#allocation9 + $0x18] sm:$0xff] }
  0x78   :  { %v1013_v36 = vpack.c.bf16 %v327_v34, %v326_v33  ;;  %v1017_v38 = vpack.c.bf16 %v329_v37, %v328_v35  ;;  %v330_v39 = vld [vmem:[#allocation9 + $0x20] sm:$0xff]  ;;  %v331_v40 = vld [vmem:[#allocation9 + $0x28] sm:$0xff]  ;;  %v332_v42 = vld [vmem:[#allocation9 + $0x30] sm:$0xff] }
  0x79   :  { %988 = vmatpush3.bf16.msra.mxu1 %v985_v13  ;;  %v1021_v41 = vpack.c.bf16 %v331_v40, %v330_v39  ;;  %v333_v43 = vld [vmem:[#allocation9 + $0x38] sm:$0xff]  ;;  %v334_v45 = vld [vmem:[#allocation9 + $0x40] sm:$0xff]  ;;  %v335_v46 = vld [vmem:[#allocation9 + $0x48] sm:$0xff] }
  0x7a   :  { %824 = vmatmul.mubr.msk.f32.vlgmr.msra.gmra.mrb[0].mxu0 %vm142_vm0, %v130_v17  ;;  %990 = vmatprep.subr.bf16.mxu1 %v989_v16  ;;  %v1025_v44 = vpack.c.bf16 %v333_v43, %v332_v42  ;;  %v1029_v47 = vpack.c.bf16 %v335_v46, %v334_v45  ;;  %v336_v48 = vld [vmem:[#allocation9 + $0x50] sm:$0xff]  ;;  %v337_v49 = vld [vmem:[#allocation9 + $0x58] sm:$0xff]  ;;  %v338_v51 = vld [vmem:[#allocation9 + $0x60] sm:$0xff] }
  0x7b   :  { %1014 = vmatprep.subr.bf16.mxu0 %v1013_v36  ;;  %v1033_v50 = vpack.c.bf16 %v337_v49, %v336_v48  ;;  %v339_v52 = vld [vmem:[#allocation9 + $0x68] sm:$0xff]  ;;  %v340_v61 = vld [vmem:[#allocation9 + $0x70] sm:$0xff]  ;;  %v341_v62 = vld [vmem:[#allocation9 + $0x78] sm:$0xff] }
  0x7c   :  { %1016 = vmatpush3.bf16.msra.mxu0 %v1013_v36  ;;  %v1037_v53 = vpack.c.bf16 %v339_v52, %v338_v51  ;;  %v727_v54 = vld [vmem:[%s1521_s2] ss:$0 sm:$0xff]  ;;  %v1041_v63 = vpack.c.bf16 %v341_v62, %v340_v61  ;;  %v426_v0 = vld [vmem:[#allocation11] sm:$0xff]  ;;  %v428_v2 = vld [vmem:[#allocation11 + $0x10] sm:$0xff] }
  0x7d   :  { %992 = vmatpush3.bf16.msra.mxu1 %v989_v16  ;;  %1018 = vmatprep.subr.bf16.mxu0 %v1017_v38  ;;  %v427_v1 = vld [vmem:[#allocation11 + $0x8] sm:$0xff]  ;;  %v429_v4 = vld [vmem:[#allocation11 + $0x18] sm:$0xff]  ;;  %v430_v6 = vld [vmem:[#allocation11 + $0x20] sm:$0xff] }
  0x7e   :  { %994 = vmatprep.subr.bf16.mxu1 %v993_v20  ;;  %v1045_v3 = vpack.c.bf16 %v427_v1, %v426_v0  ;;  %v1049_v5 = vpack.c.bf16 %v429_v4, %v428_v2  ;;  %v431_v7 = vld [vmem:[#allocation11 + $0x28] sm:$0xff]  ;;  %v432_v9 = vld [vmem:[#allocation11 + $0x30] sm:$0xff]  ;;  %v433_v10 = vld [vmem:[#allocation11 + $0x38] sm:$0xff] }
  0x7f   :  { %v1053_v8 = vpack.c.bf16 %v431_v7, %v430_v6  ;;  %v1057_v11 = vpack.c.bf16 %v433_v10, %v432_v9  ;;  %v434_v12 = vld [vmem:[#allocation11 + $0x40] sm:$0xff]  ;;  %v435_v13 = vld [vmem:[#allocation11 + $0x48] sm:$0xff]  ;;  %v436_v15 = vld [vmem:[#allocation11 + $0x50] sm:$0xff]  ;;  %v1300_v6 = vmov 0.0  }
  0x80   :  { %1020 = vmatpush3.bf16.msra.mxu0 %v1017_v38  ;;  %v1061_v14 = vpack.c.bf16 %v435_v13, %v434_v12  ;;  %v437_v16 = vld [vmem:[#allocation11 + $0x58] sm:$0xff]  ;;  %v438_v18 = vld [vmem:[#allocation11 + $0x60] sm:$0xff]  ;;  %v439_v19 = vld [vmem:[#allocation11 + $0x68] sm:$0xff] }
  0x81   :  { %996 = vmatpush3.bf16.msra.mxu1 %v993_v20  ;;  %1022 = vmatprep.subr.bf16.mxu0 %v1021_v41  ;;  %v1065_v17 = vpack.c.bf16 %v437_v16, %v436_v15  ;;  %v1069_v20 = vpack.c.bf16 %v439_v19, %v438_v18  ;;  %v730_v21 = vld [vmem:[%s1523_s4] ss:$0 sm:$0xff]  ;;  %v440_v28 = vld [vmem:[#allocation11 + $0x70] sm:$0xff]  ;;  %v526_v31 = vld [vmem:[#allocation12] sm:$0xff]  ;;  %v633_v18 = vlaneseq }
  0x82   :  { %998 = vmatprep.subr.bf16.mxu1 %v997_v23  ;;  %v528_v33 = vld [vmem:[#allocation12 + $0x10] sm:$0xff]  ;;  %v529_v35 = vld [vmem:[#allocation12 + $0x18] sm:$0xff]  ;;  %v530_v37 = vld [vmem:[#allocation12 + $0x20] sm:$0xff] }
  0x83   :  { %v1081_v36 = vpack.c.bf16 %v529_v35, %v528_v33  ;;  %v531_v38 = vld [vmem:[#allocation12 + $0x28] sm:$0xff]  ;;  %v532_v40 = vld [vmem:[#allocation12 + $0x30] sm:$0xff]  ;;  %v534_v43 = vld [vmem:[#allocation12 + $0x40] sm:$0xff]  ;;  %v634_v19 = vshrl.u32 %v633_v18, 7 }
  0x84   :  { %1024 = vmatpush3.bf16.msra.mxu0 %v1021_v41  ;;  %v1085_v39 = vpack.c.bf16 %v531_v38, %v530_v37  ;;  %v533_v41 = vld [vmem:[#allocation12 + $0x38] sm:$0xff]  ;;  %v536_v46 = vld [vmem:[#allocation12 + $0x50] sm:$0xff]  ;;  %v538_v49 = vld [vmem:[#allocation12 + $0x60] sm:$0xff] }
  0x85   :  { %1000 = vmatpush3.bf16.msra.mxu1 %v997_v23  ;;  %1026 = vmatprep.subr.bf16.mxu0 %v1025_v44  ;;  %v1089_v42 = vpack.c.bf16 %v533_v41, %v532_v40  ;;  %v731_v52 = vld [vmem:[%s1525_s6] ss:$0 sm:$0xff] }
  0x86   :  { %1002 = vmatprep.subr.bf16.mxu1 %v1001_v26  ;;  %v732_v62 = vld [vmem:[%s1527_s8] ss:$0 sm:$0xff] }
  0x87   :  { %v627_v7 = vld [vmem:[#allocation2] sm:$0x1] }
  0x88   :  { %1028 = vmatpush3.bf16.msra.mxu0 %v1025_v44  ;;  %v535_v44 = vld [vmem:[#allocation12 + $0x48] sm:$0xff] }
  0x89   :  { %1004 = vmatpush3.bf16.msra.mxu1 %v1001_v26  ;;  %1030 = vmatprep.subr.bf16.mxu0 %v1029_v47  ;;  %v1093_v45 = vpack.c.bf16 %v535_v44, %v534_v43  ;;  %v733_v9 = vld [vmem:[%s1529_s10] ss:$0 sm:$0xff]  ;;  %s715_s10 = sshll.u32 %s1302_s16, 4  ;;  %s716_s10 = int_to_ptr.vmem [resolvable:$true] %s715_s10 }
  0x8a   :  { %1006 = vmatprep.subr.bf16.mxu1 %v1005_v29  ;;  %s1258_s17 = scalar_lea.vmem %s716_s10, 16  ;;  %s1262_s1 = scalar_lea.vmem %s716_s10, 32 }
  0x8b   :  { %p1259_p6 = scmp.ne.s32.totalorder %s716_s10, %s1258_s17  ;;  %p1263_p7 = scmp.lt.s32.totalorder %s716_s10, %s716_s10 }
  0x8c   :  { %1032 = vmatpush3.bf16.msra.mxu0 %v1029_v47  ;;  %v537_v47 = vld [vmem:[#allocation12 + $0x58] sm:$0xff]  ;;  %p1264_p8 = scmp.lt.s32.totalorder %s1262_s1, %s1258_s17 }
  0x8d   :  { %1008 = vmatpush3.bf16.msra.mxu1 %v1005_v29  ;;  %1034 = vmatprep.subr.bf16.mxu0 %v1033_v50  ;;  %v441_v29 = vld [vmem:[#allocation11 + $0x78] sm:$0xff]  ;;  %v1097_v48 = vpack.c.bf16 %v537_v47, %v536_v46 }
  0x8e   :  { %1010 = vmatprep.subr.bf16.mxu1 %v1009_v32  ;;  %v1073_v30 = vpack.c.bf16 %v441_v29, %v440_v28  ;;  %p1265_p9 = por %p1264_p8, %p1263_p7 }
  0x90   :  { %1036 = vmatpush3.bf16.msra.mxu0 %v1033_v50  ;;  %v539_v50 = vld [vmem:[#allocation12 + $0x68] sm:$0xff]  ;;  %p1266_p10 = pnand %p1265_p9, %p1259_p6 }
  0x91   :  { %1012 = vmatpush3.bf16.msra.mxu1 %v1009_v32  ;;  %1038 = vmatprep.subr.bf16.mxu0 %v1037_v53  ;;  %v527_v32 = vld [vmem:[#allocation12 + $0x8] sm:$0xff]  ;;  %v1101_v51 = vpack.c.bf16 %v539_v50, %v538_v49 }
  0x92   :  { %1046 = vmatprep.subr.bf16.mxu1 %v1045_v3  ;;  %v1077_v34 = vpack.c.bf16 %v527_v32, %v526_v31 }
  0x94   :  { %1040 = vmatpush3.bf16.msra.mxu0 %v1037_v53 }
  0x95   :  { %1042 = vmatprep.subr.bf16.mxu0 %v1041_v63 }
  0x98   :  { %1044 = vmatpush3.bf16.msra.mxu0 %v1041_v63 }
  0x99   :  { %1078 = vmatprep.subr.bf16.mxu0 %v1077_v34 }
 0x14d   :  { %v825_v55 = vpop.f32.mrb[0].mxu0 }
 0x14e   :  { %v221_v56 = vadd.f32 %v825_v55, %v727_v54  ;;  %v215_v57 = vpop.f32.mrb[1].mxu0 }
 0x14f   :  { %v216_v58 = vadd.f32 %v727_v54, %v215_v57 }
 0x150   :  { %v225_v60 = vmax.f32 %v221_v56, 0.0 }
 0x151   :  { %v224_v59 = vmax.f32 %v216_v58, 0.0 }
 0x153   :  { %858 = vmatprep.mubr.f32.mxu1 %v224_v59  ;;  %v540_v59 = vld [vmem:[#allocation12 + $0x70] sm:$0xff] }
 0x154   :  { %859 = vmatmul.mubr.f32.vlgmr.msra.gmra.mrb[0].mxu1 %v225_v60  ;;  %v541_v60 = vld [vmem:[#allocation12 + $0x78] sm:$0xff] }
 0x155   :  { %1048 = vmatpush3.bf16.msra.mxu1 %v1045_v3  ;;  %v1105_v61 = vpack.c.bf16 %v541_v60, %v540_v59 }
 0x156   :  { %1050 = vmatprep.subr.bf16.mxu1 %v1049_v5 }
 0x159   :  { %1052 = vmatpush3.bf16.msra.mxu1 %v1049_v5  ;;  %v1298_v5 = vmov 0.0|0.0  }
 0x15a   :  { %1054 = vmatprep.subr.bf16.mxu1 %v1053_v8 }
 0x15d   :  { %1056 = vmatpush3.bf16.msra.mxu1 %v1053_v8  ;;  %v1301_v8 = vmov 0  }
 0x15e   :  { %1058 = vmatprep.subr.bf16.mxu1 %v1057_v11  ;;  %1125 = vset.pattern.permute.xlu0 %v1301_v8 }
 0x15f   :  { %630 = vperm.xlu0 %1125, %v627_v7  }
 0x161   :  { %1060 = vmatpush3.bf16.msra.mxu1 %v1057_v11 }
 0x162   :  { %1062 = vmatprep.subr.bf16.mxu1 %v1061_v14 }
 0x165   :  { %1064 = vmatpush3.bf16.msra.mxu1 %v1061_v14 }
 0x166   :  { %1066 = vmatprep.subr.bf16.mxu1 %v1065_v17 }
 0x169   :  { %1068 = vmatpush3.bf16.msra.mxu1 %v1065_v17  ;;  %v626_v17 = vld [vmem:[%s1530_s11] sm:$0x1] }
 0x16a   :  { %1070 = vmatprep.subr.bf16.mxu1 %v1069_v20 }
 0x16d   :  { %1072 = vmatpush3.bf16.msra.mxu1 %v1069_v20  ;;  %v635_v20 = vsub.s32 0, %v634_v19 }
 0x16e   :  { %1074 = vmatprep.subr.bf16.mxu1 %v1073_v30 }
 0x171   :  { %1076 = vmatpush3.bf16.msra.mxu1 %v1073_v30 }
 0x172   :  { %1109 = vmatprep.subr.bf16.mxu1 %v1298_v5 }
 0x227   :  { %v860_v22 = vpop.f32.mrb[0].mxu1 }
 0x228   :  { %v321_v23 = vadd.f32 %v860_v22, %v730_v21  ;;  %v315_v24 = vpop.f32.mrb[1].mxu1 }
 0x229   :  { %v316_v25 = vadd.f32 %v730_v21, %v315_v24  ;;  %v631_v21 = vpop.permute.xlu0 %630 }
 0x22a   :  { %v325_v27 = vmax.f32 %v321_v23, 0.0  ;;  %v636_v22 = vrot.slane %v631_v21, %v635_v20 }
 0x22b   :  { %v324_v26 = vmax.f32 %v316_v25, 0.0 }
 0x22d   :  { %893 = vmatprep.mubr.f32.mxu0 %v324_v26 }
 0x22e   :  { %894 = vmatmul.mubr.f32.vlgmr.msra.gmra.mrb[2].mxu0 %v325_v27 }
 0x22f   :  { %1080 = vmatpush3.bf16.msra.mxu0 %v1077_v34 }
 0x230   :  { %1082 = vmatprep.subr.bf16.mxu0 %v1081_v36 }
 0x233   :  { %1084 = vmatpush3.bf16.msra.mxu0 %v1081_v36 }
 0x234   :  { %1086 = vmatprep.subr.bf16.mxu0 %v1085_v39 }
 0x237   :  { %1088 = vmatpush3.bf16.msra.mxu0 %v1085_v39 }
 0x238   :  { %1090 = vmatprep.subr.bf16.mxu0 %v1089_v42 }
 0x23b   :  { %1092 = vmatpush3.bf16.msra.mxu0 %v1089_v42 }
 0x23c   :  { %1094 = vmatprep.subr.bf16.mxu0 %v1093_v45 }
 0x23f   :  { %1096 = vmatpush3.bf16.msra.mxu0 %v1093_v45 }
 0x240   :  { %1098 = vmatprep.subr.bf16.mxu0 %v1097_v48 }
 0x243   :  { %1100 = vmatpush3.bf16.msra.mxu0 %v1097_v48 }
 0x244   :  { %1102 = vmatprep.subr.bf16.mxu0 %v1101_v51 }
 0x247   :  { %1104 = vmatpush3.bf16.msra.mxu0 %v1101_v51 }
 0x248   :  { %1106 = vmatprep.subr.bf16.mxu0 %v1105_v61 }
 0x24b   :  { %1108 = vmatpush3.bf16.msra.mxu0 %v1105_v61 }
 0x301   :  { %v895_v53 = vpop.f32.mrb[2].mxu0 }
 0x302   :  { %v421_v54 = vadd.f32 %v895_v53, %v731_v52  ;;  %v415_v55 = vpop.f32.mrb[3].mxu0 }
 0x303   :  { %v416_v56 = vadd.f32 %v731_v52, %v415_v55 }
 0x304   :  { %v425_v58 = vmax.f32 %v421_v54, 0.0 }
 0x305   :  { %v424_v57 = vmax.f32 %v416_v56, 0.0 }
 0x307   :  { %928 = vmatprep.mubr.f32.mxu1 %v424_v57 }
 0x308   :  { %929 = vmatmul.mubr.f32.vlgmr.msra.gmra.mrb[2].mxu1 %v425_v58 }
 0x309   :  { %970 = vmatprep.mubr.msk.f32.mxu1 %vm1299_vm1, %v1300_v6 }
 0x3db   :  { %v930_v63 = vpop.f32.mrb[2].mxu1 }
 0x3dc   :  { %v521_v0 = vadd.f32 %v930_v63, %v732_v62  ;;  %v515_v1 = vpop.f32.mrb[3].mxu1 }
 0x3dd   :  { %v516_v2 = vadd.f32 %v732_v62, %v515_v1 }
 0x3de   :  { %v525_v4 = vmax.f32 %v521_v0, 0.0 }
 0x3df   :  { %v524_v3 = vmax.f32 %v516_v2, 0.0 }
 0x3e1   :  { %963 = vmatprep.mubr.f32.mxu0 %v524_v3 }
 0x3e2   :  { %964 = vmatmul.mubr.f32.vlgmr.msra.gmra.mrb[4].mxu0 %v525_v4 }
 0x4b5   :  { %v965_v10 = vpop.f32.mrb[4].mxu0 }
 0x4b6   :  { %v621_v11 = vadd.f32 %v965_v10, %v733_v9  ;;  %v615_v12 = vpop.f32.mrb[5].mxu0 }
 0x4b7   :  { %v616_v13 = vadd.f32 %v733_v9, %v615_v12 }
 0x4b8   :  { %v625_v14 = vmax.f32 %v621_v11, 0.0 }
 0x4b9   :  { %v624_v15 = vmax.f32 %v616_v13, 0.0 }
 0x4bb   :  { %v1110_v16 = vpack.c.bf16 %v625_v14, %v624_v15 }
 0x4bd   :  { %1111 = vmatpush3.bf16.xpose.msra.mxu1 %v1110_v16 }
 0x4c4   :  { %971 = vmatmul.mubr.f32.vlgmr.msra.gmra.mrb[4].mxu1 %v626_v17 }
 0x597   :  { %v703_v23 = vpop.f32.mrb[4].mxu1 }
 0x598   :  { %v704_v24 = vadd.f32 %v703_v23, %v636_v22  ;;  %v972_v25 = vpop.f32.mrb[5].mxu1 }
 0x59a   :  { %708 = vst.msk [vmem:[#allocation14] sm:$0x1] %vm707_vm2, %v704_v24 }
 0x59b   :  { %1269 = shalt.err (!%p1266_p10)
}
 0x59c   :  { %s1270_s20 = scalar_lea.hbm %s1532_s13, 16 }
 0x59d   :  { %p1271_p11 = scmp.ne.s32.totalorder %s1532_s13, %s1270_s20  ;;  %p1274_p12 = scmp.lt.u32.totalorder %s1270_s20, %s1532_s13 }
 0x59f   :  { %p1276_p13 = pnand %p1274_p12, %p1271_p11 }
 0x5a1   :  { %1279 = shalt.err (!%p1276_p13)
}
 0x5a2   :  { %718 = dma.vmem_to_hbm [thread:$0]  %s716_s10, 16, %s1532_s13, [#allocation5]  }
 0x5a3   :  { %1288 = dma.done.wait [#allocation5], 16  }
 0x5a4   :  { %1289 = vsyncadd [#allocation5], 4294967280 }
 0x5a5   :  { %722 = vsyncpa [#allocation4], 1 }
 0x5a6   :  { %723 = vsyncpa [#allocation7], 1 }
 0x5a7   :  { %724 = vsyncpa [#allocation10], 1 }
 0x5a8   :  { %725 = vsyncpa [#allocation13], 1 }
 0x5a9   :  { %726 = vsyncpa [#allocation5], 1 }

</bundles_post_ra>
